<compile_context>
chip_gen: v5e
topology: v5e:2x2
jax: 0.10.0
libtpu: 0.0.40
codegen_flags: <defaults>
</compile_context>

<pallas_src>
import jax
import jax.numpy as jnp
from jax.experimental import pallas as pl
from jax.experimental.pallas import tpu as pltpu

_LANES = 128                       # lane-dense last dim (full vreg lane width)
_FAST_PATH_ELEMS = 128 * 1024      # below this, plain jnp wins (launch overhead)
_MIN_TILE_ROWS = 512               # 256 KiB / f32 buffer
_MAX_TILE_ROWS = 8192              # 4 MiB / f32 buffer
_TARGET_GRID_STEPS = 8             # enough steps for v7x's two TensorCores
_VMEM_LIMIT_BYTES = 48 * 1024 * 1024


def _affine_kernel(wb_ref, x_ref, o_ref):
    # wb_ref: f32[2] scalar-prefetched into SMEM -> [weight, bias].
    w = wb_ref[0]
    b = wb_ref[1]
    # Pure VPU elementwise affine on a lane-dense (tile_rows, 128) block.
    o_ref[...] = (x_ref[...].astype(jnp.float32) * w + b).astype(o_ref.dtype)


def _choose_tile_rows(rows):
    t = pl.cdiv(rows, _TARGET_GRID_STEPS)
    t = max(_MIN_TILE_ROWS, min(_MAX_TILE_ROWS, t))
    return -(-t // 32) * 32        # sublane-friendly for any dtype packing


def linear_forward(x, weight, bias):
    """nn.Linear(1, 1) forward: y = x * w + b. Shape & dtype preserving."""
    orig_shape = x.shape
    orig_dtype = x.dtype
    n = x.size
    w = jnp.asarray(weight, jnp.float32).reshape(())
    b = jnp.asarray(bias, jnp.float32).reshape(())

    # --- small-N fast path: one fused XLA elementwise op, no kernel launch.
    if n < _FAST_PATH_ELEMS:
        y = x.astype(jnp.float32) * w + b
        return y.astype(orig_dtype).reshape(orig_shape)

    xf = x.reshape(-1)                     # free bitcast from (..., 1)
    rows = pl.cdiv(n, _LANES)
    padded = rows * _LANES
    aligned = padded == n
    if not aligned:
        # Minimal pad (< 128 elements) to make the slab lane-dense; the padded
        # lanes compute 0*w + b and are sliced off below.
        xf = jnp.pad(xf, (0, padded - n))
    x2 = xf.reshape(rows, _LANES)

    tile_rows = _choose_tile_rows(rows)
    grid = (pl.cdiv(rows, tile_rows),)     # boundary block masked by Pallas

    wb = jnp.stack([w, b])                 # f32[2] scalar-prefetch operand

    y2 = pl.pallas_call(
        _affine_kernel,
        out_shape=jax.ShapeDtypeStruct((rows, _LANES), orig_dtype),
        grid_spec=pltpu.PrefetchScalarGridSpec(
            num_scalar_prefetch=1,
            grid=grid,
            in_specs=[pl.BlockSpec((tile_rows, _LANES), lambda i, wb: (i, 0))],
            out_specs=pl.BlockSpec((tile_rows, _LANES), lambda i, wb: (i, 0)),
        ),
        compiler_params=pltpu.CompilerParams(
            dimension_semantics=("parallel",),
            vmem_limit_bytes=_VMEM_LIMIT_BYTES,
        ),
    )(wb, x2)

    yf = y2.reshape(-1)
    if not aligned:
        yf = yf[:n]                        # identity (skipped) when aligned
    return yf.reshape(orig_shape)


if __name__ == "__main__":
    key = jax.random.PRNGKey(0)
    kw, kb, k1, k2, k3, k4 = jax.random.split(key, 6)

    # Deterministic parameters (mimics torch's U(-1, 1) bound for fan_in=1).
    weight = jax.random.uniform(kw, (1, 1), minval=-1.0, maxval=1.0,
                                dtype=jnp.float32)
    bias = jax.random.uniform(kb, (1,), minval=-1.0, maxval=1.0,
                              dtype=jnp.float32)

    def ref(x):
        return x @ weight.T + bias

    # 1) Small batches -> jnp fast path (kernel launch not worth it here).
    for kk, batch in ((k1, 8), (k2, 300)):
        x = jax.random.normal(kk, (batch, 1), dtype=jnp.float32)
        y = linear_forward(x, weight, bias)
        jax.block_until_ready(y)
        assert y.shape == (batch, 1)
        assert jnp.allclose(y, ref(x), atol=1e-6), f"mismatch (batch={batch})"

    # 2) Aligned large batch (multiple of 128) -> Pallas kernel, no pad/slice.
    batch = 256 * 1024
    x = jax.random.normal(k3, (batch, 1), dtype=jnp.float32)
    y = linear_forward(x, weight, bias)
    jax.block_until_ready(y)
    assert y.shape == (batch, 1)
    assert jnp.allclose(y, ref(x), atol=1e-6), "mismatch (aligned kernel path)"

    # 3) Ragged large batch -> Pallas kernel, minimal pad + masked tail block.
    batch = 128 * 1024 + 77
    x = jax.random.normal(k4, (batch, 1), dtype=jnp.float32)
    y = linear_forward(x, weight, bias)
    jax.block_until_ready(y)
    assert y.shape == (batch, 1)
    assert jnp.allclose(y, ref(x), atol=1e-6), "mismatch (ragged kernel path)"

    print("KERNEL_OK")
</pallas_src>

<mosaic_0001>
module attributes {stable_mosaic.version = 11 : i64} {
  func.func @_affine_kernel(%arg0: i32, %arg1: memref<2xf32, #tpu.memory_space<smem>>, %arg2: memref<512x128xf32, #tpu.memory_space<vmem>>, %arg3: memref<512x128xf32, #tpu.memory_space<vmem>>) attributes {dimension_semantics = [#tpu.dimension_semantics<parallel>], iteration_bounds = array<i64: 4>, scalar_prefetch = 1 : i64, scratch_operands = 0 : i64, tpu.core_type = #tpu.core_type<tc>, window_params = [{transform_indices = @transform_0, window_bounds = array<i64: 512, 128>}, {transform_indices = @transform_1, window_bounds = array<i64: 512, 128>}]} {
    %c0 = arith.constant 0 : index
    %0 = memref.load %arg1[%c0] : memref<2xf32, #tpu.memory_space<smem>>
    %c1 = arith.constant 1 : index
    %1 = memref.load %arg1[%c1] : memref<2xf32, #tpu.memory_space<smem>>
    %c0_0 = arith.constant 0 : index
    %c0_1 = arith.constant 0 : index
    %2 = vector.load %arg2[%c0_0, %c0_1] : memref<512x128xf32, #tpu.memory_space<vmem>>, vector<512x128xf32>
    %3 = vector.broadcast %0 : f32 to vector<512x128xf32>
    %4 = arith.mulf %2, %3 : vector<512x128xf32>
    %5 = vector.broadcast %1 : f32 to vector<512x128xf32>
    %6 = arith.addf %4, %5 : vector<512x128xf32>
    %c0_2 = arith.constant 0 : index
    %c0_3 = arith.constant 0 : index
    %7 = vector.load %arg3[%c0_2, %c0_3] : memref<512x128xf32, #tpu.memory_space<vmem>>, vector<512x128xf32>
    tpu.vector_store %arg3[%c0_2, %c0_3], %6 {strides = array<i32>} : memref<512x128xf32, #tpu.memory_space<vmem>>, vector<512x128xf32>,
    return
  }
  func.func @transform_0(%arg0: i32, %arg1: memref<2xf32, #tpu.memory_space<smem>>) -> (i32, i32) {
    %c0_i32 = arith.constant 0 : i32
    %c0_i32_0 = arith.constant 0 : i32
    return %arg0, %c0_i32 : i32, i32
  }
  func.func @transform_1(%arg0: i32, %arg1: memref<2xf32, #tpu.memory_space<smem>>) -> (i32, i32) {
    %c0_i32 = arith.constant 0 : i32
    %c0_i32_0 = arith.constant 0 : i32
    return %arg0, %c0_i32 : i32, i32
  }
}

</mosaic_0001>

<bundles_post_ra>
// kernel: tpu_custom_call.1
= control target key start
LH: loop header
LB: loop body
LE: loop exit
PB: predicated region body
PF: predicated region fallthrough
CT: control target
= control target key end

     0   :  { %s677_s12 = smov [#allocation3]   ;;  %s1094_s0 = inlined_call_operand.hbm [shape: f32[2], index: 0, kind: input, shape index: {}]   ;;  %s1095_s1 = inlined_call_operand.hbm [shape: f32[2048,128], index: 1, kind: input, shape index: {}]   ;;  %s1096_s2 = inlined_call_operand.hbm [shape: f32[2048,128], index: 2, kind: output, shape index: {}]  }
   0x1   :  { %s8_s11 = sshll.u32 %s1094_s0, 4  ;;  %s9_s11 = int_to_ptr.hbm [resolvable:$true] %s8_s11 }
   0x2   :  { %11 = dma.hbm_to_smem %s9_s11, 16, %s677_s12, [#allocation2] }
   0x3   :  { %651 = dma.done.wait [#allocation2], 16 }
   0x4   :  { %652 = vsyncadd [#allocation2], 4294967280 }
   0x5   :  { %14 = sfence }
   0x6   :  { %15 = vsyncpa [#allocation5], 0 }
   0x7   :  { %17 = vsyncpa [#allocation5 + $0x1], 0 }
   0x8   :  { %18 = vsyncpa [#allocation6], 0 }
   0x9   :  { %20 = vsyncpa [#allocation6 + $0x1], 0  ;;  %s700_s13 = smov 0   ;;  %s702_s14 = smov 0  }
   0xa   :  { %s704_s15 = smov 0   ;;  %s706_s16 = smov 0  }
   0xb LB: > { %s721_s0 = sadd.s32 4294967295, %s675_s16   ;;  %s497_s17 = sadd.s32 4294967294, %s675_s16   ;;  %s675_s16 = sphi %s706_s16, %s1105_s16   ;;  %s671_s15 = sphi %s704_s15, %s1104_s15   ;;  %s667_s14 = sphi %s702_s14, %s1103_s14   ;;  %s663_s13 = sphi %s700_s13, %s1102_s13  }
   0xc   : > { %s725_s18 = sadd.s32 1, %s675_s16   ;;  %s33_s19 = sadd.s32 1, %s671_s15 }
   0xd   : > { %s30_s20 = ssub.s32 %s675_s16, %s725_s18  ;;  %p40_p0 = scmp.ne.s32.totalorder %s671_s15, %s667_s14 }
   0xe   : > { %p31_p1 = scmp.eq.s32.totalorder %s30_s20, 0  ;;  %p41_p2 = scmp.eq.s32.totalorder %s675_s16, 0 }
   0xf   : > { %p46_p3 = scmp.ne.s32.totalorder %s667_s14, %s663_s13  ;;  %p47_p4 = scmp.eq.s32.totalorder %s721_s0, 0 }
  0x10   : > { %s737_s21 = scalar_select %p31_p1, %s671_s15, %s33_s19  }
  0x11   : > { %p739_p5 = por %p41_p2, %p40_p0  ;;  %p743_p6 = por %p47_p4, %p46_p3 }
  0x12   : > { %p70_p7 = scmp.eq.s32.totalorder %s721_s0, 3  ;;  %p76_p8 = scmp.eq.s32.totalorder %s497_s17, 3 }
  0x13   : > { %p526_p9 = scmp.lt.s32.totalorder %s675_s16, 4  ;;  %s96_s26 = sand.u32 1, %s671_s15  }
  0x14   : > { %p749_p10 = por %p70_p7, %p40_p0  ;;  %p753_p11 = por %p76_p8, %p46_p3 }
  0x15   : > { %s512_s27 = sshll.u32 %s675_s16, 9  ;;  %s500_s28 = sshll.u32 %s96_s26, 9 }
  0x16   : > { %s105_s3 = scalar_lea.hbm %s1095_s1, %s512_s27  ;;  %s100_s5 = scalar_lea.vmem [#allocation4], %s500_s28 }
  0x17   : > { %s106_s4 = sshll.u32 %s105_s3, 4  ;;  %s108_s6 = sshll.u32 %s100_s5, 4  ;;  %s107_s4 = int_to_ptr.hbm [resolvable:$true] %s106_s4  ;;  %s109_s6 = int_to_ptr.vmem [resolvable:$true] %s108_s6 }
  0x18   : > { %p764_p12 = pnand %p526_p9, %p739_p5  ;;  %p503_p13 = scmp.ge.s32.totalorder %s675_s16, 1 }
  0x19   : > { %p116_p0 = scmp.lt.s32.totalorder %s675_s16, 5  ;;  %s97_s8 = scalar_lea.sflag [#allocation5], %s96_s26 }
  0x1a   : > { %s577_s9 = sshra.s32 %s107_s4, 4  ;;  %p581_p2 = pneg %p764_p12  ;;  %s578_s9 = int_to_ptr.hbm [resolvable:$true] %s577_s9 }
  0x1b   : > { %s579_s10 = scalar_lea.hbm %s578_s9, 512  ;;  %s584_s17 = scalar_lea.hbm %s1095_s1, 2048 }
  0x1c   : > { %p580_p1 = scmp.ne.s32.totalorder %s578_s9, %s579_s10  ;;  %p585_p5 = scmp.lt.s32.totalorder %s578_s9, %s1095_s1 }
  0x1d   : > { %p586_p7 = scmp.lt.s32.totalorder %s584_s17, %s579_s10 }
  0x1e   : > { %p582_p3 = pnand %p581_p2, %p580_p1 }
  0x1f   : > { %p587_p8 = por %p586_p7, %p585_p5 }
  0x20   : > { %p583_p4 = pneg %p582_p3 }
  0x22   : > { %p588_p9 = pnand %p587_p8, %p583_p4 }
  0x24   : > { %591 = shalt.err (!%p588_p9)
}
  0x25   : > { %s678_s22 = smov 128   ;;  %s679_s26 = smov 8  }
  0x26   : > { %521 = dma.hbm_to_vmem [thread:$0]  (!%p764_p12), %s107_s4, 8192, %s109_s6, %s97_s8, %s678_s22, %s678_s22, %s679_s26  }
  0x27   : > { %p117_p1 = pnand %p503_p13, %p116_p0 }
  0x28   : > { %s785_s27 = sand.u32 (!%p117_p1), 1, %s667_s14  }
  0x29   : > { %120 = sbr.rel (%p117_p1) target bundleno = 125 (0x7d), region = 24  ;;  %s504_s28 = sshll.u32 (!%p117_p1), %s785_s27, 9 }
  0x2a   : > { %s123_s29 = scalar_lea.sflag (!%p117_p1), [#allocation5], %s785_s27  ;;  %s791_s30 = scalar_lea.vmem (!%p117_p1), [#allocation4], %s504_s28 }
  0x2e   : > { %654 = dma.done.wait (%p743_p6), %s123_s29, 8192  }
  0x2f   : > { %656 = vsyncadd (%p743_p6), %s123_s29, 4294959104  ;;  %s148_s3 = sld [smem:[#allocation3]]  ;;  %v150_v0 = vld [vmem:[%s791_s30] sm:$0xff]  ;;  %v151_v2 = vld [vmem:[%s791_s30 + $0x8] sm:$0xff]  ;;  %s826_s23 = scalar_lea.vmem [#allocation7], %s504_s28 }
  0x30   : > { %s506_s4 = sld [smem:[#allocation3 + $0x1]]  ;;  %v152_v3 = vld [vmem:[%s791_s30 + $0x10] sm:$0xff]  ;;  %v153_v8 = vld [vmem:[%s791_s30 + $0x18] sm:$0xff]  ;;  %v154_v9 = vld [vmem:[%s791_s30 + $0x20] sm:$0xff]  ;;  %s513_s5 = sshll.u32 %s721_s0, 9 }
  0x31   : > { %v155_v10 = vld [vmem:[%s791_s30 + $0x28] sm:$0xff]  ;;  %v156_v14 = vld [vmem:[%s791_s30 + $0x30] sm:$0xff]  ;;  %v157_v15 = vld [vmem:[%s791_s30 + $0x38] sm:$0xff]  ;;  %s420_s7 = scalar_lea.hbm %s1096_s2, %s513_s5  ;;  %s421_s8 = sshll.u32 %s826_s23, 4  ;;  %s422_s8 = int_to_ptr.vmem [resolvable:$true] %s421_s8 }
  0x32   : > { %v158_v16 = vld [vmem:[%s791_s30 + $0x40] sm:$0xff]  ;;  %v159_v21 = vld [vmem:[%s791_s30 + $0x48] sm:$0xff]  ;;  %v160_v24 = vld [vmem:[%s791_s30 + $0x50] sm:$0xff]  ;;  %s423_s9 = sshll.u32 %s420_s7, 4  ;;  %s409_s10 = scalar_lea.sflag [#allocation6], %s785_s27  ;;  %s424_s9 = int_to_ptr.hbm [resolvable:$true] %s423_s9 }
  0x33   : > { %v161_v27 = vld [vmem:[%s791_s30 + $0x58] sm:$0xff]  ;;  %v162_v30 = vld [vmem:[%s791_s30 + $0x60] sm:$0xff]  ;;  %v163_v33 = vld [vmem:[%s791_s30 + $0x68] sm:$0xff]  ;;  %s621_s11 = sshra.s32 %s424_s9, 4  ;;  %s627_s20 = scalar_lea.hbm %s1096_s2, 2048  ;;  %s622_s11 = int_to_ptr.hbm [resolvable:$true] %s621_s11 }
  0x34   : > { %v164_v36 = vld [vmem:[%s791_s30 + $0x70] sm:$0xff]  ;;  %v165_v39 = vld [vmem:[%s791_s30 + $0x78] sm:$0xff]  ;;  %v166_v42 = vld [vmem:[%s791_s30 + $0x80] sm:$0xff]  ;;  %s623_s12 = scalar_lea.hbm %s622_s11, 512  ;;  %p628_p0 = scmp.lt.s32.totalorder %s622_s11, %s1096_s2 }
  0x35   : > { %v798_v1 = vstv %s148_s3  ;;  %v167_v45 = vld [vmem:[%s791_s30 + $0x88] sm:$0xff]  ;;  %v168_v48 = vld [vmem:[%s791_s30 + $0x90] sm:$0xff]  ;;  %v169_v51 = vld [vmem:[%s791_s30 + $0x98] sm:$0xff]  ;;  %p624_p6 = scmp.ne.s32.totalorder %s622_s11, %s623_s12  ;;  %p629_p2 = scmp.lt.s32.totalorder %s627_s20, %s623_s12 }
  0x36   : > { %v215_v4 = vmul.f32 %v798_v1, %v150_v0  ;;  %v803_v5 = vstv %s506_s4  ;;  %v216_v6 = vmul.f32 %v798_v1, %v151_v2  ;;  %v217_v7 = vmul.f32 %v798_v1, %v152_v3  ;;  %v170_v54 = vld [vmem:[%s791_s30 + $0xa0] sm:$0xff]  ;;  %v171_v57 = vld [vmem:[%s791_s30 + $0xa8] sm:$0xff]  ;;  %v172_v60 = vld [vmem:[%s791_s30 + $0xb0] sm:$0xff] }
  0x37   : > { %v218_v11 = vmul.f32 %v798_v1, %v153_v8  ;;  %v219_v12 = vmul.f32 %v798_v1, %v154_v9  ;;  %v220_v13 = vmul.f32 %v798_v1, %v155_v10  ;;  %v221_v20 = vmul.f32 %v798_v1, %v156_v14  ;;  %v173_v63 = vld [vmem:[%s791_s30 + $0xb8] sm:$0xff]  ;;  %v174_v3 = vld [vmem:[%s791_s30 + $0xc0] sm:$0xff]  ;;  %v176_v10 = vld [vmem:[%s791_s30 + $0xd0] sm:$0xff]  ;;  %p625_p12 = pnand %p624_p6, %p749_p10  ;;  %p630_p3 = por %p629_p2, %p628_p0 }
  0x38   : > { %v280_v17 = vadd.f32 %v803_v5, %v215_v4  ;;  %v281_v18 = vadd.f32 %v803_v5, %v216_v6  ;;  %v282_v19 = vadd.f32 %v803_v5, %v217_v7  ;;  %v222_v23 = vmul.f32 %v798_v1, %v157_v15  ;;  %v175_v7 = vld [vmem:[%s791_s30 + $0xc8] sm:$0xff] }
  0x39   : > { %v283_v22 = vadd.f32 %v803_v5, %v218_v11  ;;  %v284_v25 = vadd.f32 %v803_v5, %v219_v12  ;;  %v223_v26 = vmul.f32 %v798_v1, %v158_v16  ;;  %v285_v28 = vadd.f32 %v803_v5, %v220_v13  ;;  %v177_v13 = vld [vmem:[%s791_s30 + $0xd8] sm:$0xff]  ;;  %v178_v16 = vld [vmem:[%s791_s30 + $0xe0] sm:$0xff]  ;;  %p626_p13 = pneg %p625_p12 }
  0x3a   : > { %344 = vst [vmem:[%s826_s23] sm:$0xff] %v280_v17  ;;  %v224_v29 = vmul.f32 %v798_v1, %v159_v21  ;;  %v286_v31 = vadd.f32 %v803_v5, %v221_v20  ;;  %v225_v32 = vmul.f32 %v798_v1, %v160_v24  ;;  %v287_v34 = vadd.f32 %v803_v5, %v222_v23 }
  0x3b   : > { %345 = vst [vmem:[%s826_s23 + $0x8] sm:$0xff] %v281_v18  ;;  %v226_v35 = vmul.f32 %v798_v1, %v161_v27  ;;  %v288_v37 = vadd.f32 %v803_v5, %v223_v26  ;;  %v227_v38 = vmul.f32 %v798_v1, %v162_v30  ;;  %v228_v41 = vmul.f32 %v798_v1, %v163_v33  ;;  %p631_p4 = pnand %p630_p3, %p626_p13 }
  0x3c   : > { %346 = vst [vmem:[%s826_s23 + $0x10] sm:$0xff] %v282_v19  ;;  %v289_v40 = vadd.f32 %v803_v5, %v224_v29  ;;  %v290_v43 = vadd.f32 %v803_v5, %v225_v32  ;;  %v229_v44 = vmul.f32 %v798_v1, %v164_v36  ;;  %v230_v47 = vmul.f32 %v798_v1, %v165_v39  ;;  %v179_v19 = vld [vmem:[%s791_s30 + $0xe8] sm:$0xff] }
  0x3d   : > { %347 = vst [vmem:[%s826_s23 + $0x18] sm:$0xff] %v283_v22  ;;  %v291_v46 = vadd.f32 %v803_v5, %v226_v35  ;;  %v292_v49 = vadd.f32 %v803_v5, %v227_v38  ;;  %v231_v50 = vmul.f32 %v798_v1, %v166_v42  ;;  %v293_v52 = vadd.f32 %v803_v5, %v228_v41  ;;  %v180_v22 = vld [vmem:[%s791_s30 + $0xf0] sm:$0xff] }
  0x3e   : > { %348 = vst [vmem:[%s826_s23 + $0x20] sm:$0xff] %v284_v25  ;;  %v232_v53 = vmul.f32 %v798_v1, %v167_v45  ;;  %v294_v55 = vadd.f32 %v803_v5, %v229_v44  ;;  %v233_v56 = vmul.f32 %v798_v1, %v168_v48  ;;  %v295_v58 = vadd.f32 %v803_v5, %v230_v47  ;;  %v181_v25 = vld [vmem:[%s791_s30 + $0xf8] sm:$0xff] }
  0x3f   : > { %349 = vst [vmem:[%s826_s23 + $0x28] sm:$0xff] %v285_v28  ;;  %v234_v59 = vmul.f32 %v798_v1, %v169_v51  ;;  %v296_v61 = vadd.f32 %v803_v5, %v231_v50  ;;  %v235_v62 = vmul.f32 %v798_v1, %v170_v54  ;;  %v236_v2 = vmul.f32 %v798_v1, %v171_v57  ;;  %v182_v28 = vld [vmem:[%s791_s30 + $0x100] sm:$0xff] }
  0x40   : > { %350 = vst [vmem:[%s826_s23 + $0x30] sm:$0xff] %v286_v31  ;;  %v297_v0 = vadd.f32 %v803_v5, %v232_v53  ;;  %v298_v4 = vadd.f32 %v803_v5, %v233_v56  ;;  %v237_v6 = vmul.f32 %v798_v1, %v172_v60  ;;  %v238_v9 = vmul.f32 %v798_v1, %v173_v63  ;;  %v183_v31 = vld [vmem:[%s791_s30 + $0x108] sm:$0xff] }
  0x41   : > { %351 = vst [vmem:[%s826_s23 + $0x38] sm:$0xff] %v287_v34  ;;  %v299_v8 = vadd.f32 %v803_v5, %v234_v59  ;;  %v300_v11 = vadd.f32 %v803_v5, %v235_v62  ;;  %v239_v12 = vmul.f32 %v798_v1, %v174_v3  ;;  %v301_v14 = vadd.f32 %v803_v5, %v236_v2  ;;  %v184_v34 = vld [vmem:[%s791_s30 + $0x110] sm:$0xff] }
  0x42   : > { %352 = vst [vmem:[%s826_s23 + $0x40] sm:$0xff] %v288_v37  ;;  %v240_v15 = vmul.f32 %v798_v1, %v175_v7  ;;  %v302_v17 = vadd.f32 %v803_v5, %v237_v6  ;;  %v241_v18 = vmul.f32 %v798_v1, %v176_v10  ;;  %v303_v20 = vadd.f32 %v803_v5, %v238_v9  ;;  %v185_v37 = vld [vmem:[%s791_s30 + $0x118] sm:$0xff] }
  0x43   : > { %353 = vst [vmem:[%s826_s23 + $0x48] sm:$0xff] %v289_v40  ;;  %v242_v21 = vmul.f32 %v798_v1, %v177_v13  ;;  %v304_v23 = vadd.f32 %v803_v5, %v239_v12  ;;  %v243_v24 = vmul.f32 %v798_v1, %v178_v16  ;;  %v244_v27 = vmul.f32 %v798_v1, %v179_v19  ;;  %v186_v40 = vld [vmem:[%s791_s30 + $0x120] sm:$0xff] }
  0x44   : > { %354 = vst [vmem:[%s826_s23 + $0x50] sm:$0xff] %v290_v43  ;;  %v305_v26 = vadd.f32 %v803_v5, %v240_v15  ;;  %v306_v29 = vadd.f32 %v803_v5, %v241_v18  ;;  %v245_v30 = vmul.f32 %v798_v1, %v180_v22  ;;  %v246_v33 = vmul.f32 %v798_v1, %v181_v25  ;;  %v187_v43 = vld [vmem:[%s791_s30 + $0x128] sm:$0xff] }
  0x45   : > { %355 = vst [vmem:[%s826_s23 + $0x58] sm:$0xff] %v291_v46  ;;  %v307_v32 = vadd.f32 %v803_v5, %v242_v21  ;;  %v308_v35 = vadd.f32 %v803_v5, %v243_v24  ;;  %v247_v36 = vmul.f32 %v798_v1, %v182_v28  ;;  %v309_v38 = vadd.f32 %v803_v5, %v244_v27  ;;  %v188_v46 = vld [vmem:[%s791_s30 + $0x130] sm:$0xff] }
  0x46   : > { %356 = vst [vmem:[%s826_s23 + $0x60] sm:$0xff] %v292_v49  ;;  %v248_v39 = vmul.f32 %v798_v1, %v183_v31  ;;  %v310_v41 = vadd.f32 %v803_v5, %v245_v30  ;;  %v249_v42 = vmul.f32 %v798_v1, %v184_v34  ;;  %v311_v44 = vadd.f32 %v803_v5, %v246_v33  ;;  %v189_v49 = vld [vmem:[%s791_s30 + $0x138] sm:$0xff] }
  0x47   : > { %357 = vst [vmem:[%s826_s23 + $0x68] sm:$0xff] %v293_v52  ;;  %v250_v45 = vmul.f32 %v798_v1, %v185_v37  ;;  %v312_v47 = vadd.f32 %v803_v5, %v247_v36  ;;  %v251_v48 = vmul.f32 %v798_v1, %v186_v40  ;;  %v252_v51 = vmul.f32 %v798_v1, %v187_v43  ;;  %v190_v52 = vld [vmem:[%s791_s30 + $0x140] sm:$0xff] }
  0x48   : > { %358 = vst [vmem:[%s826_s23 + $0x70] sm:$0xff] %v294_v55  ;;  %v313_v50 = vadd.f32 %v803_v5, %v248_v39  ;;  %v314_v53 = vadd.f32 %v803_v5, %v249_v42  ;;  %v253_v54 = vmul.f32 %v798_v1, %v188_v46  ;;  %v191_v55 = vld [vmem:[%s791_s30 + $0x148] sm:$0xff]  ;;  %v254_v57 = vmul.f32 %v798_v1, %v189_v49 }
  0x49   : > { %359 = vst [vmem:[%s826_s23 + $0x78] sm:$0xff] %v295_v58  ;;  %v315_v56 = vadd.f32 %v803_v5, %v250_v45  ;;  %v192_v58 = vld [vmem:[%s791_s30 + $0x150] sm:$0xff]  ;;  %v316_v59 = vadd.f32 %v803_v5, %v251_v48  ;;  %v255_v60 = vmul.f32 %v798_v1, %v190_v52  ;;  %v317_v62 = vadd.f32 %v803_v5, %v252_v51 }
  0x4a   : > { %360 = vst [vmem:[%s826_s23 + $0x80] sm:$0xff] %v296_v61  ;;  %v193_v61 = vld [vmem:[%s791_s30 + $0x158] sm:$0xff]  ;;  %v256_v63 = vmul.f32 %v798_v1, %v191_v55  ;;  %v318_v2 = vadd.f32 %v803_v5, %v253_v54  ;;  %v257_v3 = vmul.f32 %v798_v1, %v192_v58  ;;  %v319_v6 = vadd.f32 %v803_v5, %v254_v57 }
  0x4b   : > { %361 = vst [vmem:[%s826_s23 + $0x88] sm:$0xff] %v297_v0  ;;  %v194_v0 = vld [vmem:[%s791_s30 + $0x160] sm:$0xff]  ;;  %v258_v7 = vmul.f32 %v798_v1, %v193_v61  ;;  %v320_v9 = vadd.f32 %v803_v5, %v255_v60 }
  0x4c   : > { %362 = vst [vmem:[%s826_s23 + $0x90] sm:$0xff] %v298_v4  ;;  %v195_v4 = vld [vmem:[%s791_s30 + $0x168] sm:$0xff]  ;;  %v259_v10 = vmul.f32 %v798_v1, %v194_v0  ;;  %v321_v12 = vadd.f32 %v803_v5, %v256_v63  ;;  %v322_v15 = vadd.f32 %v803_v5, %v257_v3 }
  0x4d   : > { %363 = vst [vmem:[%s826_s23 + $0x98] sm:$0xff] %v299_v8  ;;  %v196_v8 = vld [vmem:[%s791_s30 + $0x170] sm:$0xff]  ;;  %v260_v13 = vmul.f32 %v798_v1, %v195_v4  ;;  %v323_v18 = vadd.f32 %v803_v5, %v258_v7 }
  0x4e   : > { %364 = vst [vmem:[%s826_s23 + $0xa0] sm:$0xff] %v300_v11  ;;  %v197_v11 = vld [vmem:[%s791_s30 + $0x178] sm:$0xff]  ;;  %v261_v16 = vmul.f32 %v798_v1, %v196_v8  ;;  %v324_v21 = vadd.f32 %v803_v5, %v259_v10 }
  0x4f   : > { %365 = vst [vmem:[%s826_s23 + $0xa8] sm:$0xff] %v301_v14  ;;  %v198_v14 = vld [vmem:[%s791_s30 + $0x180] sm:$0xff]  ;;  %v262_v19 = vmul.f32 %v798_v1, %v197_v11  ;;  %v325_v24 = vadd.f32 %v803_v5, %v260_v13 }
  0x50   : > { %366 = vst [vmem:[%s826_s23 + $0xb0] sm:$0xff] %v302_v17  ;;  %v199_v17 = vld [vmem:[%s791_s30 + $0x188] sm:$0xff]  ;;  %v263_v22 = vmul.f32 %v798_v1, %v198_v14  ;;  %v326_v27 = vadd.f32 %v803_v5, %v261_v16 }
  0x51   : > { %367 = vst [vmem:[%s826_s23 + $0xb8] sm:$0xff] %v303_v20  ;;  %v200_v20 = vld [vmem:[%s791_s30 + $0x190] sm:$0xff]  ;;  %v264_v25 = vmul.f32 %v798_v1, %v199_v17  ;;  %v327_v30 = vadd.f32 %v803_v5, %v262_v19 }
  0x52   : > { %368 = vst [vmem:[%s826_s23 + $0xc0] sm:$0xff] %v304_v23  ;;  %v201_v23 = vld [vmem:[%s791_s30 + $0x198] sm:$0xff]  ;;  %v265_v28 = vmul.f32 %v798_v1, %v200_v20  ;;  %v328_v33 = vadd.f32 %v803_v5, %v263_v22 }
  0x53   : > { %369 = vst [vmem:[%s826_s23 + $0xc8] sm:$0xff] %v305_v26  ;;  %v202_v26 = vld [vmem:[%s791_s30 + $0x1a0] sm:$0xff]  ;;  %v266_v31 = vmul.f32 %v798_v1, %v201_v23  ;;  %v329_v36 = vadd.f32 %v803_v5, %v264_v25 }
  0x54   : > { %370 = vst [vmem:[%s826_s23 + $0xd0] sm:$0xff] %v306_v29  ;;  %v203_v29 = vld [vmem:[%s791_s30 + $0x1a8] sm:$0xff]  ;;  %v267_v34 = vmul.f32 %v798_v1, %v202_v26  ;;  %v330_v39 = vadd.f32 %v803_v5, %v265_v28 }
  0x55   : > { %371 = vst [vmem:[%s826_s23 + $0xd8] sm:$0xff] %v307_v32  ;;  %v204_v32 = vld [vmem:[%s791_s30 + $0x1b0] sm:$0xff]  ;;  %v268_v37 = vmul.f32 %v798_v1, %v203_v29  ;;  %v331_v42 = vadd.f32 %v803_v5, %v266_v31 }
  0x56   : > { %372 = vst [vmem:[%s826_s23 + $0xe0] sm:$0xff] %v308_v35  ;;  %v205_v35 = vld [vmem:[%s791_s30 + $0x1b8] sm:$0xff]  ;;  %v269_v40 = vmul.f32 %v798_v1, %v204_v32  ;;  %v332_v45 = vadd.f32 %v803_v5, %v267_v34 }
  0x57   : > { %373 = vst [vmem:[%s826_s23 + $0xe8] sm:$0xff] %v309_v38  ;;  %v206_v38 = vld [vmem:[%s791_s30 + $0x1c0] sm:$0xff]  ;;  %v270_v43 = vmul.f32 %v798_v1, %v205_v35  ;;  %v333_v48 = vadd.f32 %v803_v5, %v268_v37 }
  0x58   : > { %374 = vst [vmem:[%s826_s23 + $0xf0] sm:$0xff] %v310_v41  ;;  %v207_v41 = vld [vmem:[%s791_s30 + $0x1c8] sm:$0xff]  ;;  %v271_v46 = vmul.f32 %v798_v1, %v206_v38  ;;  %v334_v51 = vadd.f32 %v803_v5, %v269_v40 }
  0x59   : > { %375 = vst [vmem:[%s826_s23 + $0xf8] sm:$0xff] %v311_v44  ;;  %v208_v44 = vld [vmem:[%s791_s30 + $0x1d0] sm:$0xff]  ;;  %v272_v49 = vmul.f32 %v798_v1, %v207_v41  ;;  %v335_v54 = vadd.f32 %v803_v5, %v270_v43 }
  0x5a   : > { %376 = vst [vmem:[%s826_s23 + $0x100] sm:$0xff] %v312_v47  ;;  %v209_v47 = vld [vmem:[%s791_s30 + $0x1d8] sm:$0xff]  ;;  %v273_v52 = vmul.f32 %v798_v1, %v208_v44  ;;  %v336_v57 = vadd.f32 %v803_v5, %v271_v46 }
  0x5b   : > { %377 = vst [vmem:[%s826_s23 + $0x108] sm:$0xff] %v313_v50  ;;  %v210_v50 = vld [vmem:[%s791_s30 + $0x1e0] sm:$0xff]  ;;  %v274_v55 = vmul.f32 %v798_v1, %v209_v47  ;;  %v337_v60 = vadd.f32 %v803_v5, %v272_v49 }
  0x5c   : > { %378 = vst [vmem:[%s826_s23 + $0x110] sm:$0xff] %v314_v53  ;;  %v211_v53 = vld [vmem:[%s791_s30 + $0x1e8] sm:$0xff]  ;;  %v275_v58 = vmul.f32 %v798_v1, %v210_v50 }
  0x5d   : > { %379 = vst [vmem:[%s826_s23 + $0x118] sm:$0xff] %v315_v56  ;;  %v212_v56 = vld [vmem:[%s791_s30 + $0x1f0] sm:$0xff]  ;;  %v276_v61 = vmul.f32 %v798_v1, %v211_v53  ;;  %v339_v0 = vadd.f32 %v803_v5, %v274_v55 }
  0x5e   : > { %380 = vst [vmem:[%s826_s23 + $0x120] sm:$0xff] %v316_v59  ;;  %v213_v59 = vld [vmem:[%s791_s30 + $0x1f8] sm:$0xff]  ;;  %v277_v63 = vmul.f32 %v798_v1, %v212_v56  ;;  %v340_v3 = vadd.f32 %v803_v5, %v275_v58 }
  0x5f   : > { %381 = vst [vmem:[%s826_s23 + $0x128] sm:$0xff] %v317_v62  ;;  %v338_v62 = vadd.f32 %v803_v5, %v273_v52  ;;  %v341_v4 = vadd.f32 %v803_v5, %v276_v61 }
  0x60   : > { %382 = vst [vmem:[%s826_s23 + $0x130] sm:$0xff] %v318_v2  ;;  %v278_v2 = vmul.f32 %v798_v1, %v213_v59 }
  0x61   : > { %383 = vst [vmem:[%s826_s23 + $0x138] sm:$0xff] %v319_v6  ;;  %v342_v6 = vadd.f32 %v803_v5, %v277_v63 }
  0x62   : > { %384 = vst [vmem:[%s826_s23 + $0x140] sm:$0xff] %v320_v9  ;;  %v343_v7 = vadd.f32 %v803_v5, %v278_v2 }
  0x63   : > { %385 = vst [vmem:[%s826_s23 + $0x148] sm:$0xff] %v321_v12 }
  0x64   : > { %386 = vst [vmem:[%s826_s23 + $0x150] sm:$0xff] %v322_v15 }
  0x65   : > { %387 = vst [vmem:[%s826_s23 + $0x158] sm:$0xff] %v323_v18 }
  0x66   : > { %388 = vst [vmem:[%s826_s23 + $0x160] sm:$0xff] %v324_v21 }
  0x67   : > { %389 = vst [vmem:[%s826_s23 + $0x168] sm:$0xff] %v325_v24 }
  0x68   : > { %390 = vst [vmem:[%s826_s23 + $0x170] sm:$0xff] %v326_v27 }
  0x69   : > { %391 = vst [vmem:[%s826_s23 + $0x178] sm:$0xff] %v327_v30 }
  0x6a   : > { %392 = vst [vmem:[%s826_s23 + $0x180] sm:$0xff] %v328_v33 }
  0x6b   : > { %393 = vst [vmem:[%s826_s23 + $0x188] sm:$0xff] %v329_v36 }
  0x6c   : > { %394 = vst [vmem:[%s826_s23 + $0x190] sm:$0xff] %v330_v39 }
  0x6d   : > { %395 = vst [vmem:[%s826_s23 + $0x198] sm:$0xff] %v331_v42 }
  0x6e   : > { %396 = vst [vmem:[%s826_s23 + $0x1a0] sm:$0xff] %v332_v45 }
  0x6f   : > { %397 = vst [vmem:[%s826_s23 + $0x1a8] sm:$0xff] %v333_v48 }
  0x70   : > { %398 = vst [vmem:[%s826_s23 + $0x1b0] sm:$0xff] %v334_v51 }
  0x71   : > { %399 = vst [vmem:[%s826_s23 + $0x1b8] sm:$0xff] %v335_v54 }
  0x72   : > { %400 = vst [vmem:[%s826_s23 + $0x1c0] sm:$0xff] %v336_v57 }
  0x73   : > { %401 = vst [vmem:[%s826_s23 + $0x1c8] sm:$0xff] %v337_v60 }
  0x74   : > { %402 = vst [vmem:[%s826_s23 + $0x1d0] sm:$0xff] %v338_v62 }
  0x75   : > { %403 = vst [vmem:[%s826_s23 + $0x1d8] sm:$0xff] %v339_v0 }
  0x76   : > { %404 = vst [vmem:[%s826_s23 + $0x1e0] sm:$0xff] %v340_v3 }
  0x77   : > { %405 = vst [vmem:[%s826_s23 + $0x1e8] sm:$0xff] %v341_v4 }
  0x78   : > { %406 = vst [vmem:[%s826_s23 + $0x1f0] sm:$0xff] %v342_v6 }
  0x79   : > { %407 = vst [vmem:[%s826_s23 + $0x1f8] sm:$0xff] %v343_v7 }
  0x7a   : > { %634 = shalt.err (!%p631_p4)
}
  0x7b   : > { %s680_s27 = smov 128   ;;  %s681_s28 = smov 8  }
  0x7c   : > { %516 = dma.vmem_to_hbm [thread:$0]  (%p749_p10), %s422_s8, 8192, %s424_s9, %s409_s10, %s680_s27, %s680_s27, %s681_s28  }
  0x7d PF: > { %p527_p5 = scmp.ge.s32.totalorder %s675_s16, 2  ;;  %s438_s29 = sand.u32 1, %s663_s13  }
  0x7e   : > { %s439_s30 = scalar_lea.sflag [#allocation6], %s438_s29 }
  0x7f   : > { %p523_p7 = pnand %p527_p5, %p753_p11 }
  0x81   : > { %p524_p8 = pneg %p523_p7 }
  0x83   : > { %658 = dma.done.wait (%p524_p8), %s439_s30, 8192  }
  0x84   : > { %660 = vsyncadd (%p524_p8), %s439_s30, 4294959104  ;;  %p23_p9 = scmp.ge.s32.totalorder %s725_s18, 6   ;;  %s1102_s13 = smov %s667_s14 }
  0x85   : > { %s1103_s14 = smov %s671_s15  ;;  %s1104_s15 = smov %s737_s21 }
  0x86   : > { %s1105_s16 = smov %s725_s18  ;;  %25 = sbr.rel (!%p23_p9) target bundleno = 11 (0xb), region = 69 }
  0x8b   :  { %445 = vsyncpa [#allocation5], 1 }
  0x8c   :  { %447 = vsyncpa [#allocation5 + $0x1], 1 }
  0x8d   :  { %448 = vsyncpa [#allocation6], 1 }
  0x8e   :  { %450 = vsyncpa [#allocation6 + $0x1], 1 }

</bundles_post_ra>
